<compile_context>
chip_gen: v7x
topology: tpu7x:2x2x1
jax: 0.10.0
libtpu: 0.0.40
codegen_flags: <defaults>
</compile_context>

<pallas_src>
import functools

import jax
import jax.numpy as jnp
from jax.experimental import pallas as pl
from jax.experimental.pallas import tpu as pltpu

HIDDEN = 64
_LANE = 128


def _round_up(x, m):
    return -(-x // m) * m


def _critic_kernel(x_ref, w1_ref, b1_ref, w2_ref, b2_ref, w3_ref, b3_ref, o_ref):
    # x: (tb, obs_dim) bf16; weights bf16; biases f32; f32 MXU accumulation.
    x = x_ref[...]

    # Layer 1: Linear + ReLU
    h1 = jnp.dot(x, w1_ref[...], preferred_element_type=jnp.float32) + b1_ref[...]
    h1 = jnp.maximum(h1, 0.0).astype(jnp.bfloat16)

    # Layer 2: Linear + ReLU
    h2 = jnp.dot(h1, w2_ref[...], preferred_element_type=jnp.float32) + b2_ref[...]
    h2 = jnp.maximum(h2, 0.0).astype(jnp.bfloat16)

    # Layer 3: Linear (no activation) -> Q values (output feature dim padded to
    # a multiple of 128 lanes by the wrapper; extra columns are exactly zero).
    q = jnp.dot(h2, w3_ref[...], preferred_element_type=jnp.float32) + b3_ref[...]
    o_ref[...] = q.astype(o_ref.dtype)


@functools.partial(jax.jit, static_argnames=("block_b",))
def critic_forward(svec, params, *, block_b=4096):
    """Pallas forward pass. svec: (B, obs_dim) -> (B, act_dim) float32."""
    w1, b1, w2, b2, w3, b3 = params
    B, obs_dim = svec.shape
    act_dim = w3.shape[1]
    out_pad = _round_up(act_dim, _LANE)  # lane-dense output feature dim

    # bf16 MXU operands (f32 x f32 is a multi-pass emulation on the bf16 MXU);
    # biases stay f32 and all accumulation inside the kernel is f32.
    x = svec.astype(jnp.bfloat16)
    w1b = w1.astype(jnp.bfloat16)
    w2b = w2.astype(jnp.bfloat16)
    w3b = w3.astype(jnp.bfloat16)
    b1f = b1.astype(jnp.float32)
    b2f = b2.astype(jnp.float32)
    b3f = b3.astype(jnp.float32)
    if out_pad != act_dim:
        w3b = jnp.pad(w3b, ((0, 0), (0, out_pad - act_dim)))
        b3f = jnp.pad(b3f, ((0, 0), (0, out_pad - act_dim)))

    # Batch tile selection: multiple of 8, capped at block_b, never (much)
    # bigger than needed for small B. Tiles are balanced across the grid; the
    # last block may be ragged (Pallas masks OOB reads/writes; rows are
    # independent so this is safe). No wrapper-side full-tile padding.
    tb = min(block_b, _round_up(max(B, 1), 8))
    num_tiles = pl.cdiv(B, tb)
    if num_tiles == 1 and B >= 2048:
        num_tiles = 2  # keep both TensorCores busy on 2-TC chips (v7x)
    tb = _round_up(pl.cdiv(B, num_tiles), 8)
    num_tiles = pl.cdiv(B, tb)

    batch_in_spec = pl.BlockSpec((tb, obs_dim), lambda i: (i, 0))
    batch_out_spec = pl.BlockSpec((tb, out_pad), lambda i: (i, 0))
    # Weights / biases: full block, same block every grid step -> VMEM resident.
    resident = lambda arr: pl.BlockSpec(arr.shape, lambda i: (0, 0))

    out = pl.pallas_call(
        _critic_kernel,
        out_shape=jax.ShapeDtypeStruct((B, out_pad), jnp.float32),
        grid=(num_tiles,),
        in_specs=[
            batch_in_spec,
            resident(w1b), resident(b1f),
            resident(w2b), resident(b2f),
            resident(w3b), resident(b3f),
        ],
        out_specs=batch_out_spec,
        compiler_params=pltpu.CompilerParams(
            dimension_semantics=("parallel",),
            vmem_limit_bytes=48 * 1024 * 1024,
        ),
    )(x, w1b, b1f, w2b, b2f, w3b, b3f)

    return out[:, :act_dim] if out_pad != act_dim else out


def compute_value(svec, aprob, params):
    """Equivalent of CriticModel.compute_value (trivial reduction, plain jnp)."""
    q_all = critic_forward(svec, params)
    return jnp.sum(q_all * aprob, axis=1)


def init_params(key, obs_dim, act_dim):
    """Deterministic init matching the shapes implied by CriticModel.__init__."""
    k1, k2, k3, k4, k5, k6 = jax.random.split(key, 6)

    def linear_init(kw, kb, fan_in, fan_out):
        # PyTorch nn.Linear default: U(-1/sqrt(fan_in), 1/sqrt(fan_in))
        bound = 1.0 / jnp.sqrt(jnp.float32(fan_in))
        w = jax.random.uniform(kw, (fan_in, fan_out), jnp.float32, -bound, bound)
        b = jax.random.uniform(kb, (1, fan_out), jnp.float32, -bound, bound)
        return w, b

    w1, b1 = linear_init(k1, k2, obs_dim, HIDDEN)
    w2, b2 = linear_init(k3, k4, HIDDEN, HIDDEN)
    w3, b3 = linear_init(k5, k6, HIDDEN, act_dim)
    return (w1, b1, w2, b2, w3, b3)


def reference_forward(svec, params):
    """Pure-JAX f32 reference for correctness check."""
    w1, b1, w2, b2, w3, b3 = params
    h1 = jnp.maximum(svec @ w1 + b1, 0.0)
    h2 = jnp.maximum(h1 @ w2 + b2, 0.0)
    return h2 @ w3 + b3


if __name__ == "__main__":
    key = jax.random.PRNGKey(0)
    k_param, k_x1, k_x2, k_ap = jax.random.split(key, 4)

    obs_dim = 32
    act_dim = 4
    params = init_params(k_param, obs_dim, act_dim)

    # bf16 matmul operands -> compare to f32 reference with loose tolerances.
    ATOL = 3e-2
    RTOL = 3e-2

    # Small batch: single small grid step, tb == 8.
    batch_small = 8
    svec_small = jax.random.normal(k_x1, (batch_small, obs_dim), dtype=jnp.float32)
    q_small = jax.block_until_ready(critic_forward(svec_small, params))
    q_small_ref = reference_forward(svec_small, params)
    assert q_small.shape == (batch_small, act_dim)
    assert jnp.allclose(q_small, q_small_ref, atol=ATOL, rtol=RTOL)

    # Multi-tile grid with a ragged last block (300 rows, forced tb=104 via a
    # small block_b) -- exercises masked boundary handling with no jnp.pad.
    batch_big = 300
    svec_big = jax.random.normal(k_x2, (batch_big, obs_dim), dtype=jnp.float32)
    q_big = jax.block_until_ready(critic_forward(svec_big, params, block_b=128))
    q_big_ref = reference_forward(svec_big, params)
    assert q_big.shape == (batch_big, act_dim)
    assert jnp.allclose(q_big, q_big_ref, atol=ATOL, rtol=RTOL)

    # compute_value equivalent (plain jnp reduction over kernel output).
    aprob = jax.nn.softmax(jax.random.normal(k_ap, (batch_big, act_dim)), axis=1)
    v = jax.block_until_ready(compute_value(svec_big, aprob, params))
    v_ref = jnp.sum(q_big_ref * aprob, axis=1)
    assert v.shape == (batch_big,)
    assert jnp.allclose(v, v_ref, atol=ATOL, rtol=RTOL)

    print("KERNEL_OK")
</pallas_src>

<mosaic_0001>
module attributes {stable_mosaic.version = 11 : i64} {
  func.func @_critic_kernel(%arg0: i32, %arg1: memref<8x32xbf16, #tpu.memory_space<vmem>>, %arg2: memref<32x64xbf16, #tpu.memory_space<vmem>>, %arg3: memref<1x64xf32, #tpu.memory_space<vmem>>, %arg4: memref<64x64xbf16, #tpu.memory_space<vmem>>, %arg5: memref<1x64xf32, #tpu.memory_space<vmem>>, %arg6: memref<64x128xbf16, #tpu.memory_space<vmem>>, %arg7: memref<1x128xf32, #tpu.memory_space<vmem>>, %arg8: memref<8x128xf32, #tpu.memory_space<vmem>>) attributes {dimension_semantics = [#tpu.dimension_semantics<parallel>], iteration_bounds = array<i64: 1>, scalar_prefetch = 0 : i64, scratch_operands = 0 : i64, tpu.core_type = #tpu.core_type<tc>, window_params = [{transform_indices = @transform_0, window_bounds = array<i64: 8, 32>}, {pipeline_mode = #tpu.pipeline_mode<synchronous>, transform_indices = @transform_1, window_bounds = array<i64: 32, 64>}, {pipeline_mode = #tpu.pipeline_mode<synchronous>, transform_indices = @transform_2, window_bounds = array<i64: 1, 64>}, {pipeline_mode = #tpu.pipeline_mode<synchronous>, transform_indices = @transform_3, window_bounds = array<i64: 64, 64>}, {pipeline_mode = #tpu.pipeline_mode<synchronous>, transform_indices = @transform_4, window_bounds = array<i64: 1, 64>}, {pipeline_mode = #tpu.pipeline_mode<synchronous>, transform_indices = @transform_5, window_bounds = array<i64: 64, 128>}, {pipeline_mode = #tpu.pipeline_mode<synchronous>, transform_indices = @transform_6, window_bounds = array<i64: 1, 128>}, {transform_indices = @transform_7, window_bounds = array<i64: 8, 128>}]} {
    %c0 = arith.constant 0 : index
    %c0_0 = arith.constant 0 : index
    %0 = vector.load %arg1[%c0, %c0_0] : memref<8x32xbf16, #tpu.memory_space<vmem>>, vector<8x32xbf16>
    %c0_1 = arith.constant 0 : index
    %c0_2 = arith.constant 0 : index
    %1 = vector.load %arg2[%c0_1, %c0_2] : memref<32x64xbf16, #tpu.memory_space<vmem>>, vector<32x64xbf16>
    %cst = arith.constant dense<0.000000e+00> : vector<8x64xf32>
    %2 = tpu.matmul %0, %1, %cst {dimension_numbers = #tpu.dot_dimension_numbers<[1], [0], [0], [1], [0, 0, 1, 1], [], []>} : vector<8x32xbf16>, vector<32x64xbf16>, vector<8x64xf32> -> vector<8x64xf32>
    %c0_3 = arith.constant 0 : index
    %c0_4 = arith.constant 0 : index
    %3 = vector.load %arg3[%c0_3, %c0_4] : memref<1x64xf32, #tpu.memory_space<vmem>>, vector<1x64xf32>
    %4 = vector.broadcast %3 : vector<1x64xf32> to vector<8x64xf32>
    %5 = arith.addf %2, %4 : vector<8x64xf32>
    %cst_5 = arith.constant 0.000000e+00 : f32
    %6 = vector.broadcast %cst_5 : f32 to vector<8x64xf32>
    %7 = arith.maximumf %5, %6 : vector<8x64xf32>
    %8 = arith.truncf %7 : vector<8x64xf32> to vector<8x64xbf16>
    %c0_6 = arith.constant 0 : index
    %c0_7 = arith.constant 0 : index
    %9 = vector.load %arg4[%c0_6, %c0_7] : memref<64x64xbf16, #tpu.memory_space<vmem>>, vector<64x64xbf16>
    %cst_8 = arith.constant dense<0.000000e+00> : vector<8x64xf32>
    %10 = tpu.matmul %8, %9, %cst_8 {dimension_numbers = #tpu.dot_dimension_numbers<[1], [0], [0], [1], [0, 0, 1, 1], [], []>} : vector<8x64xbf16>, vector<64x64xbf16>, vector<8x64xf32> -> vector<8x64xf32>
    %c0_9 = arith.constant 0 : index
    %c0_10 = arith.constant 0 : index
    %11 = vector.load %arg5[%c0_9, %c0_10] : memref<1x64xf32, #tpu.memory_space<vmem>>, vector<1x64xf32>
    %12 = vector.broadcast %11 : vector<1x64xf32> to vector<8x64xf32>
    %13 = arith.addf %10, %12 : vector<8x64xf32>
    %cst_11 = arith.constant 0.000000e+00 : f32
    %14 = vector.broadcast %cst_11 : f32 to vector<8x64xf32>
    %15 = arith.maximumf %13, %14 : vector<8x64xf32>
    %16 = arith.truncf %15 : vector<8x64xf32> to vector<8x64xbf16>
    %c0_12 = arith.constant 0 : index
    %c0_13 = arith.constant 0 : index
    %17 = vector.load %arg6[%c0_12, %c0_13] : memref<64x128xbf16, #tpu.memory_space<vmem>>, vector<64x128xbf16>
    %cst_14 = arith.constant dense<0.000000e+00> : vector<8x128xf32>
    %18 = tpu.matmul %16, %17, %cst_14 {dimension_numbers = #tpu.dot_dimension_numbers<[1], [0], [0], [1], [0, 0, 1, 1], [], []>} : vector<8x64xbf16>, vector<64x128xbf16>, vector<8x128xf32> -> vector<8x128xf32>
    %c0_15 = arith.constant 0 : index
    %c0_16 = arith.constant 0 : index
    %19 = vector.load %arg7[%c0_15, %c0_16] : memref<1x128xf32, #tpu.memory_space<vmem>>, vector<1x128xf32>
    %20 = vector.broadcast %19 : vector<1x128xf32> to vector<8x128xf32>
    %21 = arith.addf %18, %20 : vector<8x128xf32>
    %c0_17 = arith.constant 0 : index
    %c0_18 = arith.constant 0 : index
    %22 = vector.load %arg8[%c0_17, %c0_18] : memref<8x128xf32, #tpu.memory_space<vmem>>, vector<8x128xf32>
    tpu.vector_store %arg8[%c0_17, %c0_18], %21 {strides = array<i32>} : memref<8x128xf32, #tpu.memory_space<vmem>>, vector<8x128xf32>,
    return
  }
  func.func @transform_0(%arg0: i32) -> (i32, i32) {
    %c0_i32 = arith.constant 0 : i32
    %c0_i32_0 = arith.constant 0 : i32
    return %arg0, %c0_i32 : i32, i32
  }
  func.func @transform_1(%arg0: i32) -> (i32, i32) {
    %c0_i32 = arith.constant 0 : i32
    %c0_i32_0 = arith.constant 0 : i32
    %c0_i32_1 = arith.constant 0 : i32
    return %c0_i32, %c0_i32_0 : i32, i32
  }
  func.func @transform_2(%arg0: i32) -> (i32, i32) {
    %c0_i32 = arith.constant 0 : i32
    %c0_i32_0 = arith.constant 0 : i32
    %c0_i32_1 = arith.constant 0 : i32
    return %c0_i32, %c0_i32_0 : i32, i32
  }
  func.func @transform_3(%arg0: i32) -> (i32, i32) {
    %c0_i32 = arith.constant 0 : i32
    %c0_i32_0 = arith.constant 0 : i32
    %c0_i32_1 = arith.constant 0 : i32
    return %c0_i32, %c0_i32_0 : i32, i32
  }
  func.func @transform_4(%arg0: i32) -> (i32, i32) {
    %c0_i32 = arith.constant 0 : i32
    %c0_i32_0 = arith.constant 0 : i32
    %c0_i32_1 = arith.constant 0 : i32
    return %c0_i32, %c0_i32_0 : i32, i32
  }
  func.func @transform_5(%arg0: i32) -> (i32, i32) {
    %c0_i32 = arith.constant 0 : i32
    %c0_i32_0 = arith.constant 0 : i32
    %c0_i32_1 = arith.constant 0 : i32
    return %c0_i32, %c0_i32_0 : i32, i32
  }
  func.func @transform_6(%arg0: i32) -> (i32, i32) {
    %c0_i32 = arith.constant 0 : i32
    %c0_i32_0 = arith.constant 0 : i32
    %c0_i32_1 = arith.constant 0 : i32
    return %c0_i32, %c0_i32_0 : i32, i32
  }
  func.func @transform_7(%arg0: i32) -> (i32, i32) {
    %c0_i32 = arith.constant 0 : i32
    %c0_i32_0 = arith.constant 0 : i32
    return %arg0, %c0_i32 : i32, i32
  }
}

</mosaic_0001>

<bundles_post_ra>
// kernel: critic_forward.1
= control target key start
LH: loop header
LB: loop body
LE: loop exit
PB: predicated region body
PF: predicated region fallthrough
CT: control target
= control target key end

     0   :  { %v342_v0 = vmov 0.0   ;;  %vm343_vm0 = vmmov 0   ;;  %vm51_vm1 = vcmask 261120   ;;  %vm136_vm2 = vcmask 523264   ;;  %s434_s1 = inlined_call_operand.vmem [shape: bf16[32,64], index: 1, kind: input, shape index: {}]   ;;  %s435_s3 = inlined_call_operand.vmem [shape: bf16[64,64], index: 3, kind: input, shape index: {}]   ;;  %s436_s0 = inlined_call_operand.vmem [shape: bf16[8,32], index: 0, kind: input, shape index: {}]   ;;  %s437_s5 = inlined_call_operand.vmem [shape: bf16[64,128], index: 5, kind: input, shape index: {}]   ;;  %s438_s2 = inlined_call_operand.vmem [shape: f32[1,64], index: 2, kind: input, shape index: {}]   ;;  %s439_s4 = inlined_call_operand.vmem [shape: f32[1,64], index: 4, kind: input, shape index: {}]   ;;  %s440_s6 = inlined_call_operand.vmem [shape: f32[1,128], index: 6, kind: input, shape index: {}]   ;;  %s441_s7 = inlined_call_operand.vmem [shape: f32[8,128], index: 7, kind: output, shape index: {}]  }
   0x1   :  { %298 = vmatprep.subr.bf16.mxu0 %v342_v0  ;;  %v332_v1 = vld [vmem:[%s434_s1] sm:$0xff]   ;;  %302 = vmatprep.mubr.msk.bf16.mxu0 %vm343_vm0, %v342_v0  ;;  %v333_v2 = vld [vmem:[%s434_s1 + $0x8] sm:$0xff]   ;;  %v336_v6 = vld [vmem:[%s435_s3 + $0x10] sm:$0xff]  }
   0x2   :  { %306 = vmatprep.subr.bf16.mxu1 %v342_v0  ;;  %314 = vmatprep.mubr.msk.bf16.mxu1 %vm343_vm0, %v342_v0  ;;  %v334_v3 = vld [vmem:[%s435_s3] sm:$0xff]   ;;  %v335_v4 = vld [vmem:[%s435_s3 + $0x8] sm:$0xff]   ;;  %v337_v7 = vld [vmem:[%s435_s3 + $0x18] sm:$0xff]  }
   0x3   :  { %299 = vmatpush3.bf16.msra.mxu0 %v332_v1  ;;  %307 = vmatpush3.bf16.msra.mxu1 %v334_v3  ;;  %v27_v5 = vld [vmem:[%s436_s0] sm:$0xf]  ;;  %v339_v9 = vld [vmem:[%s437_s5 + $0x8] sm:$0xff]   ;;  %v340_v18 = vld [vmem:[%s437_s5 + $0x10] sm:$0xff]  }
   0x4   :  { %300 = vmatprep.subr.bf16.mxu0 %v342_v0  ;;  %308 = vmatprep.subr.bf16.mxu1 %v342_v0  ;;  %v338_v8 = vld [vmem:[%s437_s5] sm:$0xff]   ;;  %v341_v19 = vld [vmem:[%s437_s5 + $0x18] sm:$0xff]  }
   0x5   :  { %v269_v10 = vld [vmem:[%s438_s2] ss:$0 sm:$0xff] }
   0x6   :  { %v273_v20 = vld [vmem:[%s439_s4] ss:$0 sm:$0xff] }
   0x7   :  { %301 = vmatpush3.bf16.msra.mxu0 %v333_v2  ;;  %309 = vmatpush3.bf16.msra.mxu1 %v335_v4  ;;  %v279_v28 = vld [vmem:[%s440_s6] ss:$0 sm:$0xff] }
   0x8   :  { %318 = vmatprep.subr.bf16.mxu0 %v342_v0  ;;  %310 = vmatprep.subr.bf16.mxu1 %v342_v0 }
   0xa   :  { %303 = vmatmul.mubr.msk.bf16.vlgmr.msra.gmra.mrb[0].mxu0 %vm51_vm1, %v27_v5 }
   0xb   :  { %326 = vmatprep.mubr.msk.bf16.mxu0 %vm343_vm0, %v342_v0  ;;  %311 = vmatpush3.bf16.msra.mxu1 %v336_v6 }
   0xc   :  { %312 = vmatprep.subr.bf16.mxu1 %v342_v0  ;;  %319 = vmatpush3.bf16.msra.mxu0 %v338_v8 }
   0xd   :  { %320 = vmatprep.subr.bf16.mxu0 %v342_v0 }
   0xf   :  { %313 = vmatpush3.bf16.msra.mxu1 %v337_v7 }
  0x10   :  { %321 = vmatpush3.bf16.msra.mxu0 %v339_v9 }
  0x11   :  { %322 = vmatprep.subr.bf16.mxu0 %v342_v0 }
  0x14   :  { %323 = vmatpush3.bf16.msra.mxu0 %v340_v18 }
  0x15   :  { %324 = vmatprep.subr.bf16.mxu0 %v342_v0 }
  0x18   :  { %325 = vmatpush3.bf16.msra.mxu0 %v341_v19 }
  0xdd   :  { %v89_v11 = vpop.f32.mrb[0].mxu0 }
  0xde   :  { %v90_v12 = vadd.f32 %v269_v10, %v89_v11  ;;  %v304_v13 = vpop.f32.mrb[1].mxu0 }
  0xdf   :  { %v92_v14 = vpop.f32.mrb[2].mxu0 }
  0xe0   :  { %v95_v15 = vmax.f32 %v90_v12, 0.0  ;;  %v305_v16 = vpop.f32.mrb[3].mxu0 }
  0xe2   :  { %v96_v17 = vpack.c.bf16 %v95_v15, %v95_v15 }
  0xe4   :  { %315 = vmatmul.mubr.msk.bf16.vlgmr.msra.gmra.mrb[0].mxu1 %vm136_vm2, %v96_v17 }
 0x1b7   :  { %v174_v21 = vpop.f32.mrb[0].mxu1 }
 0x1b8   :  { %v175_v22 = vadd.f32 %v273_v20, %v174_v21  ;;  %v316_v23 = vpop.f32.mrb[1].mxu1 }
 0x1b9   :  { %v177_v24 = vpop.f32.mrb[2].mxu1 }
 0x1ba   :  { %v180_v25 = vmax.f32 %v175_v22, 0.0  ;;  %v317_v26 = vpop.f32.mrb[3].mxu1 }
 0x1bc   :  { %v181_v27 = vpack.c.bf16 %v180_v25, %v180_v25 }
 0x1be   :  { %327 = vmatmul.mubr.msk.bf16.vlgmr.msra.gmra.mrb[4].mxu0 %vm136_vm2, %v181_v27 }
 0x291   :  { %v258_v29 = vpop.f32.mrb[4].mxu0 }
 0x292   :  { %v259_v30 = vadd.f32 %v279_v28, %v258_v29  ;;  %v328_v31 = vpop.f32.mrb[5].mxu0 }
 0x293   :  { %v261_v32 = vpop.f32.mrb[6].mxu0 }
 0x294   :  { %264 = vst [vmem:[%s441_s7] sm:$0xff] %v259_v30  ;;  %v329_v33 = vpop.f32.mrb[7].mxu0 }

</bundles_post_ra>
